<compile_context>
chip_gen: v7x
topology: tpu7x:2x2x1
jax: 0.10.0
libtpu: 0.0.40
codegen_flags: <defaults>
</compile_context>

<pallas_src>
import functools

import jax
import jax.numpy as jnp
from jax.experimental import pallas as pl
from jax.experimental.pallas import tpu as pltpu


def _sogclr_kernel(hq_ref, hk_ref, u_ref, u_out_ref, loss_out_ref,
                   qn_scr, sum_e, sum_el, pos_acc, *,
                   B, gamma, inv_T, denom_inv):
    """Grid = (query-row tiles, key tiles). Key axis is a reduction."""
    qi = pl.program_id(0)
    ki = pl.program_id(1)
    TQ = hq_ref.shape[0]
    TK = hk_ref.shape[0]

    # --- init per row-tile: normalize query rows once, zero accumulators ---
    @pl.when(ki == 0)
    def _init():
        hq = hq_ref[...].astype(jnp.float32)
        # F.normalize: x / max(||x||, 1e-12)  ==  x * rsqrt(max(||x||^2, 1e-24))
        qn = hq * jax.lax.rsqrt(
            jnp.maximum(jnp.sum(hq * hq, axis=1, keepdims=True), 1e-24))
        qn_scr[...] = qn.astype(jnp.bfloat16)          # bf16 MXU operand
        sum_e[...] = jnp.zeros_like(sum_e)
        sum_el[...] = jnp.zeros_like(sum_el)
        pos_acc[...] = jnp.zeros_like(pos_acc)

    # --- normalize the current key tile (f32 epilogue, bf16 for the MXU) ---
    hk = hk_ref[...].astype(jnp.float32)
    kn = hk * jax.lax.rsqrt(
        jnp.maximum(jnp.sum(hk * hk, axis=1, keepdims=True), 1e-24))
    kn_bf = kn.astype(jnp.bfloat16)

    # S tile = qn · knᵀ, contracting the feature dim of BOTH operands (no .T).
    s = jax.lax.dot_general(qn_scr[...], kn_bf,
                            dimension_numbers=(((1,), (1,)), ((), ())),
                            preferred_element_type=jnp.float32)     # (TQ, TK)

    # Global row/col indices inside the full (2B, 2B) similarity matrix.
    row_g = qi * TQ + jax.lax.broadcasted_iota(jnp.int32, (TQ, TK), 0)
    col_g = ki * TK + jax.lax.broadcasted_iota(jnp.int32, (TQ, TK), 1)
    partner = jnp.where(row_g < B, row_g + B, row_g - B)   # positive-pair column
    is_pos = col_g == partner
    excluded = is_pos | (col_g == row_g)                   # positive + diagonal

    # Masked exp of negatives (replaces "- LARGE" + one-hot neg_mask).
    e = jnp.where(excluded, 0.0, jnp.exp(s * inv_T))
    sum_e[...] += jnp.sum(e, axis=1, keepdims=True)
    sum_el[...] += jnp.sum(e * s, axis=1, keepdims=True)
    # The positive logit lives in exactly one key tile per row.
    pos_acc[...] += jnp.sum(jnp.where(is_pos, s, 0.0), axis=1, keepdims=True)

    # --- finalize on the last key tile ---------------------------------------
    @pl.when(ki == pl.num_programs(1) - 1)
    def _finalize():
        # u_r = (1-gamma)*u_old + gamma * sum(neg_exp) / (2(B-1))
        u_r = (1.0 - gamma) * u_ref[...] + gamma * denom_inv * sum_e[...]
        u_out_ref[...] = u_r
        # expsum = sum(neg_exp * logits) / (2(B-1) * u)   (weights never built)
        expsum = sum_el[...] * denom_inv * pl.reciprocal(u_r, approx=True)
        # loss_row = -(pos_logit - expsum)
        loss_out_ref[...] = expsum - pos_acc[...]


def _pick_tile(n, cap):
    """Largest multiple of 8 that divides n and is <= cap; else full extent."""
    best = None
    t = 8
    while t <= min(cap, n):
        if n % t == 0:
            best = t
        t += 8
    return best if best is not None else n


def sogclr_loss(hidden, index, u, *, gamma=0.8, temperature=0.1,
                tq=None, tk=None):
    """Returns (scalar loss, updated u buffer). `hidden` is (2B, D), any float dtype."""
    two_b, D = hidden.shape
    B = two_b // 2
    assert 2 * B == two_b

    # Gather of running stats (glue). Global row r of the kernel uses
    # u[index[r mod B]].
    u_old = jnp.take(u, index).astype(jnp.float32).reshape(B, 1)
    u_full = jnp.concatenate([u_old, u_old], axis=0)                 # (2B, 1)

    # Tile sizes: biggest divisors of 2B under generation-friendly caps
    # (keeps hq/hk blocks + bf16 scratch well inside a 64 MiB v7x VMEM).
    TQ = tq if tq is not None else _pick_tile(two_b, 256)
    TK = tk if tk is not None else _pick_tile(two_b, 512)
    grid = (two_b // TQ, two_b // TK)

    kernel = functools.partial(
        _sogclr_kernel, B=B, gamma=float(gamma),
        inv_T=1.0 / float(temperature),
        denom_inv=1.0 / (2.0 * (B - 1)))

    u_row, loss_row = pl.pallas_call(
        kernel,
        out_shape=(jax.ShapeDtypeStruct((two_b, 1), jnp.float32),     # u per row
                   jax.ShapeDtypeStruct((two_b, 1), jnp.float32)),    # loss per row
        grid=grid,
        in_specs=[pl.BlockSpec((TQ, D), lambda qi, ki: (qi, 0)),      # query rows
                  pl.BlockSpec((TK, D), lambda qi, ki: (ki, 0)),      # key rows
                  pl.BlockSpec((TQ, 1), lambda qi, ki: (qi, 0))],     # u_old rows
        out_specs=(pl.BlockSpec((TQ, 1), lambda qi, ki: (qi, 0)),
                   pl.BlockSpec((TQ, 1), lambda qi, ki: (qi, 0))),
        scratch_shapes=[pltpu.VMEM((TQ, D), jnp.bfloat16),    # cached normalized q tile
                        pltpu.VMEM((TQ, 1), jnp.float32),     # sum of neg exp
                        pltpu.VMEM((TQ, 1), jnp.float32),     # sum of neg exp * logit
                        pltpu.VMEM((TQ, 1), jnp.float32)],    # positive logit
        compiler_params=pltpu.CompilerParams(
            dimension_semantics=("parallel", "arbitrary"),
            vmem_limit_bytes=64 * 1024 * 1024),
    )(hidden, hidden, u_full)

    # O(B) pairing of the two halves + scatter back into the N-sized buffer.
    u1 = u_row[:B, 0]
    u2 = u_row[B:, 0]
    loss = jnp.mean(loss_row[:B, 0] + loss_row[B:, 0])
    u_updated = u.at[index].set(u1 + u2)
    return loss, u_updated


def _sogclr_loss_ref(hidden, index, u, *, gamma=0.8, temperature=0.1):
    """Pure-JAX f32 reference mirroring the PyTorch forward."""
    LARGE = 1e9
    two_b, _ = hidden.shape
    B = two_b // 2
    hn = hidden.astype(jnp.float32)
    hn = hn / jnp.maximum(jnp.linalg.norm(hn, axis=1, keepdims=True), 1e-12)
    h1, h2 = hn[:B], hn[B:]
    masks = jnp.eye(B, dtype=jnp.float32)
    labels = jnp.eye(B, 2 * B, dtype=jnp.float32)
    logits_aa = h1 @ h1.T - masks * LARGE
    logits_bb = h2 @ h2.T - masks * LARGE
    logits_ab = h1 @ h2.T
    logits_ba = h2 @ h1.T
    l1 = jnp.concatenate([logits_ab, logits_aa], 1)
    l2 = jnp.concatenate([logits_ba, logits_bb], 1)
    neg_mask = 1.0 - labels
    n1 = jnp.exp(l1 / temperature) * neg_mask
    n2 = jnp.exp(l2 / temperature) * neg_mask
    denom = 2 * (B - 1)
    u_old = u[index]
    u1 = (1 - gamma) * u_old + gamma * n1.sum(1) / denom
    u2 = (1 - gamma) * u_old + gamma * n2.sum(1) / denom
    w1 = n1 / u1[:, None]
    w2 = n2 / u2[:, None]
    e1 = (w1 * l1).sum(1, keepdims=True) / denom
    e2 = (w2 * l2).sum(1, keepdims=True) / denom
    loss_a = -(labels * (l1 - e1)).sum(1)
    loss_b = -(labels * (l2 - e2)).sum(1)
    return (loss_a + loss_b).mean(), u.at[index].set(u1 + u2)


if __name__ == "__main__":
    key = jax.random.PRNGKey(0)
    B, D, N = 8, 128, 1024                       # small synthetic shapes
    k1, _ = jax.random.split(key)
    hidden = jax.random.normal(k1, (2 * B, D), dtype=jnp.float32)
    index = jnp.array([3, 100, 7, 512, 42, 999, 0, 256], dtype=jnp.int32)
    u = jnp.zeros((N,), dtype=jnp.float32)       # torch.zeros(N)

    # Multi-tile grid (2 query tiles x 2 key tiles) to exercise accumulation.
    loss, u_upd = sogclr_loss(hidden, index, u, tq=8, tk=8)
    jax.block_until_ready((loss, u_upd))

    loss_ref, u_ref = _sogclr_loss_ref(hidden, index, u)
    # Tolerance loosened vs. the f32 reference because the MXU operands are
    # bf16 and the u-reciprocal uses the EUP approx path.
    assert jnp.allclose(loss, loss_ref, rtol=2e-2, atol=2e-2), (loss, loss_ref)
    assert jnp.allclose(u_upd, u_ref, rtol=2e-2, atol=2e-2)

    # Default tile-selection path (single-tile grid at this size).
    loss2, u_upd2 = sogclr_loss(hidden, index, u)
    jax.block_until_ready((loss2, u_upd2))
    assert jnp.allclose(loss2, loss_ref, rtol=2e-2, atol=2e-2), (loss2, loss_ref)
    assert jnp.allclose(u_upd2, u_ref, rtol=2e-2, atol=2e-2)

    print("KERNEL_OK")
</pallas_src>

<mosaic_0001>
module attributes {stable_mosaic.version = 11 : i64} {
  func.func @_sogclr_kernel(%arg0: i32, %arg1: i32, %arg2: memref<8x128xf32, #tpu.memory_space<vmem>>, %arg3: memref<8x128xf32, #tpu.memory_space<vmem>>, %arg4: memref<8x1xf32, #tpu.memory_space<vmem>>, %arg5: memref<8x1xf32, #tpu.memory_space<vmem>>, %arg6: memref<8x1xf32, #tpu.memory_space<vmem>>, %arg7: memref<8x128xbf16, #tpu.memory_space<vmem>>, %arg8: memref<8x1xf32, #tpu.memory_space<vmem>>, %arg9: memref<8x1xf32, #tpu.memory_space<vmem>>, %arg10: memref<8x1xf32, #tpu.memory_space<vmem>>) attributes {dimension_semantics = [#tpu.dimension_semantics<parallel>, #tpu.dimension_semantics<arbitrary>], iteration_bounds = array<i64: 2, 2>, scalar_prefetch = 0 : i64, scratch_operands = 4 : i64, tpu.core_type = #tpu.core_type<tc>, window_params = [{transform_indices = @transform_0, window_bounds = array<i64: 8, 128>}, {transform_indices = @transform_1, window_bounds = array<i64: 8, 128>}, {transform_indices = @transform_2, window_bounds = array<i64: 8, 1>}, {transform_indices = @transform_3, window_bounds = array<i64: 8, 1>}, {transform_indices = @transform_4, window_bounds = array<i64: 8, 1>}]} {
    %c0_i32 = arith.constant 0 : i32
    %0 = arith.cmpi eq, %arg1, %c0_i32 : i32
    %1 = arith.extui %0 : i1 to i32
    %c0_i32_0 = arith.constant 0 : i32
    %2 = arith.cmpi ne, %1, %c0_i32_0 : i32
    scf.if %2 {
      %c0_29 = arith.constant 0 : index
      %c0_30 = arith.constant 0 : index
      %59 = vector.load %arg2[%c0_29, %c0_30] : memref<8x128xf32, #tpu.memory_space<vmem>>, vector<8x128xf32>
      %60 = arith.mulf %59, %59 : vector<8x128xf32>
      %cst_31 = arith.constant dense<0.000000e+00> : vector<8xf32>
      %61 = vector.multi_reduction <add>, %60, %cst_31 [1] : vector<8x128xf32> to vector<8xf32>
      %62 = vector.shape_cast %61 : vector<8xf32> to vector<8x1xf32>
      %cst_32 = arith.constant 1.000000e-24 : f32
      %63 = vector.broadcast %cst_32 : f32 to vector<8x1xf32>
      %64 = arith.maximumf %62, %63 : vector<8x1xf32>
      %65 = math.rsqrt %64 : vector<8x1xf32>
      %66 = vector.broadcast %65 : vector<8x1xf32> to vector<8x128xf32>
      %67 = arith.mulf %59, %66 : vector<8x128xf32>
      %68 = arith.truncf %67 : vector<8x128xf32> to vector<8x128xbf16>
      %c0_33 = arith.constant 0 : index
      %c0_34 = arith.constant 0 : index
      %69 = vector.load %arg7[%c0_33, %c0_34] : memref<8x128xbf16, #tpu.memory_space<vmem>>, vector<8x128xbf16>
      tpu.vector_store %arg7[%c0_33, %c0_34], %68 {strides = array<i32>} : memref<8x128xbf16, #tpu.memory_space<vmem>>, vector<8x128xbf16>,
      %cst_35 = arith.constant 0.000000e+00 : f32
      %70 = vector.broadcast %cst_35 : f32 to vector<8x1xf32>
      %c0_36 = arith.constant 0 : index
      %c0_37 = arith.constant 0 : index
      %71 = vector.load %arg8[%c0_36, %c0_37] : memref<8x1xf32, #tpu.memory_space<vmem>>, vector<8x1xf32>
      tpu.vector_store %arg8[%c0_36, %c0_37], %70 {strides = array<i32>} : memref<8x1xf32, #tpu.memory_space<vmem>>, vector<8x1xf32>,
      %cst_38 = arith.constant 0.000000e+00 : f32
      %72 = vector.broadcast %cst_38 : f32 to vector<8x1xf32>
      %c0_39 = arith.constant 0 : index
      %c0_40 = arith.constant 0 : index
      %73 = vector.load %arg9[%c0_39, %c0_40] : memref<8x1xf32, #tpu.memory_space<vmem>>, vector<8x1xf32>
      tpu.vector_store %arg9[%c0_39, %c0_40], %72 {strides = array<i32>} : memref<8x1xf32, #tpu.memory_space<vmem>>, vector<8x1xf32>,
      %cst_41 = arith.constant 0.000000e+00 : f32
      %74 = vector.broadcast %cst_41 : f32 to vector<8x1xf32>
      %c0_42 = arith.constant 0 : index
      %c0_43 = arith.constant 0 : index
      %75 = vector.load %arg10[%c0_42, %c0_43] : memref<8x1xf32, #tpu.memory_space<vmem>>, vector<8x1xf32>
      tpu.vector_store %arg10[%c0_42, %c0_43], %74 {strides = array<i32>} : memref<8x1xf32, #tpu.memory_space<vmem>>, vector<8x1xf32>,
    } else {
    }
    %c0 = arith.constant 0 : index
    %c0_1 = arith.constant 0 : index
    %3 = vector.load %arg3[%c0, %c0_1] : memref<8x128xf32, #tpu.memory_space<vmem>>, vector<8x128xf32>
    %4 = arith.mulf %3, %3 : vector<8x128xf32>
    %cst = arith.constant dense<0.000000e+00> : vector<8xf32>
    %5 = vector.multi_reduction <add>, %4, %cst [1] : vector<8x128xf32> to vector<8xf32>
    %6 = vector.shape_cast %5 : vector<8xf32> to vector<8x1xf32>
    %cst_2 = arith.constant 1.000000e-24 : f32
    %7 = vector.broadcast %cst_2 : f32 to vector<8x1xf32>
    %8 = arith.maximumf %6, %7 : vector<8x1xf32>
    %9 = math.rsqrt %8 : vector<8x1xf32>
    %10 = vector.broadcast %9 : vector<8x1xf32> to vector<8x128xf32>
    %11 = arith.mulf %3, %10 : vector<8x128xf32>
    %12 = arith.truncf %11 : vector<8x128xf32> to vector<8x128xbf16>
    %c0_3 = arith.constant 0 : index
    %c0_4 = arith.constant 0 : index
    %13 = vector.load %arg7[%c0_3, %c0_4] : memref<8x128xbf16, #tpu.memory_space<vmem>>, vector<8x128xbf16>
    %cst_5 = arith.constant dense<0.000000e+00> : vector<8x8xf32>
    %14 = tpu.matmul %13, %12, %cst_5 {dimension_numbers = #tpu.dot_dimension_numbers<[1], [1], [0], [0], [0, 0, 1, 0], [], []>} : vector<8x128xbf16>, vector<8x128xbf16>, vector<8x8xf32> -> vector<8x8xf32>
    %c8_i32 = arith.constant 8 : i32
    %15 = arith.muli %arg0, %c8_i32 : i32
    %16 = tpu.iota {dimensions = array<i32: 0>} : vector<8x8xi32>
    %17 = vector.broadcast %15 : i32 to vector<8x8xi32>
    %18 = arith.addi %17, %16 : vector<8x8xi32>
    %c8_i32_6 = arith.constant 8 : i32
    %19 = arith.muli %arg1, %c8_i32_6 : i32
    %20 = tpu.iota {dimensions = array<i32: 1>} : vector<8x8xi32>
    %21 = vector.broadcast %19 : i32 to vector<8x8xi32>
    %22 = arith.addi %21, %20 : vector<8x8xi32>
    %c8_i32_7 = arith.constant 8 : i32
    %23 = vector.broadcast %c8_i32_7 : i32 to vector<8x8xi32>
    %24 = arith.cmpi slt, %18, %23 : vector<8x8xi32>
    %c8_i32_8 = arith.constant 8 : i32
    %25 = vector.broadcast %c8_i32_8 : i32 to vector<8x8xi32>
    %26 = arith.addi %18, %25 : vector<8x8xi32>
    %c8_i32_9 = arith.constant 8 : i32
    %27 = vector.broadcast %c8_i32_9 : i32 to vector<8x8xi32>
    %28 = arith.subi %18, %27 : vector<8x8xi32>
    %29 = arith.select %24, %26, %28 : vector<8x8xi1>, vector<8x8xi32>
    %30 = arith.cmpi eq, %22, %29 : vector<8x8xi32>
    %31 = arith.cmpi eq, %22, %18 : vector<8x8xi32>
    %32 = arith.ori %30, %31 : vector<8x8xi1>
    %cst_10 = arith.constant 1.000000e+01 : f32
    %33 = vector.broadcast %cst_10 : f32 to vector<8x8xf32>
    %34 = arith.mulf %14, %33 : vector<8x8xf32>
    %35 = math.exp %34 : vector<8x8xf32>
    %cst_11 = arith.constant 0.000000e+00 : f32
    %36 = vector.broadcast %cst_11 : f32 to vector<8x8xf32>
    %37 = arith.select %32, %36, %35 : vector<8x8xi1>, vector<8x8xf32>
    %c0_12 = arith.constant 0 : index
    %c0_13 = arith.constant 0 : index
    %38 = vector.load %arg8[%c0_12, %c0_13] : memref<8x1xf32, #tpu.memory_space<vmem>>, vector<8x1xf32>
    %cst_14 = arith.constant dense<0.000000e+00> : vector<8xf32>
    %39 = vector.multi_reduction <add>, %37, %cst_14 [1] : vector<8x8xf32> to vector<8xf32>
    %40 = vector.shape_cast %39 : vector<8xf32> to vector<8x1xf32>
    %41 = arith.addf %38, %40 : vector<8x1xf32>
    %c0_15 = arith.constant 0 : index
    %c0_16 = arith.constant 0 : index
    %42 = vector.load %arg8[%c0_15, %c0_16] : memref<8x1xf32, #tpu.memory_space<vmem>>, vector<8x1xf32>
    tpu.vector_store %arg8[%c0_15, %c0_16], %41 {strides = array<i32>} : memref<8x1xf32, #tpu.memory_space<vmem>>, vector<8x1xf32>,
    %c0_17 = arith.constant 0 : index
    %c0_18 = arith.constant 0 : index
    %43 = vector.load %arg9[%c0_17, %c0_18] : memref<8x1xf32, #tpu.memory_space<vmem>>, vector<8x1xf32>
    %44 = arith.mulf %37, %14 : vector<8x8xf32>
    %cst_19 = arith.constant dense<0.000000e+00> : vector<8xf32>
    %45 = vector.multi_reduction <add>, %44, %cst_19 [1] : vector<8x8xf32> to vector<8xf32>
    %46 = vector.shape_cast %45 : vector<8xf32> to vector<8x1xf32>
    %47 = arith.addf %43, %46 : vector<8x1xf32>
    %c0_20 = arith.constant 0 : index
    %c0_21 = arith.constant 0 : index
    %48 = vector.load %arg9[%c0_20, %c0_21] : memref<8x1xf32, #tpu.memory_space<vmem>>, vector<8x1xf32>
    tpu.vector_store %arg9[%c0_20, %c0_21], %47 {strides = array<i32>} : memref<8x1xf32, #tpu.memory_space<vmem>>, vector<8x1xf32>,
    %c0_22 = arith.constant 0 : index
    %c0_23 = arith.constant 0 : index
    %49 = vector.load %arg10[%c0_22, %c0_23] : memref<8x1xf32, #tpu.memory_space<vmem>>, vector<8x1xf32>
    %cst_24 = arith.constant 0.000000e+00 : f32
    %50 = vector.broadcast %cst_24 : f32 to vector<8x8xf32>
    %51 = arith.select %30, %14, %50 : vector<8x8xi1>, vector<8x8xf32>
    %cst_25 = arith.constant dense<0.000000e+00> : vector<8xf32>
    %52 = vector.multi_reduction <add>, %51, %cst_25 [1] : vector<8x8xf32> to vector<8xf32>
    %53 = vector.shape_cast %52 : vector<8xf32> to vector<8x1xf32>
    %54 = arith.addf %49, %53 : vector<8x1xf32>
    %c0_26 = arith.constant 0 : index
    %c0_27 = arith.constant 0 : index
    %55 = vector.load %arg10[%c0_26, %c0_27] : memref<8x1xf32, #tpu.memory_space<vmem>>, vector<8x1xf32>
    tpu.vector_store %arg10[%c0_26, %c0_27], %54 {strides = array<i32>} : memref<8x1xf32, #tpu.memory_space<vmem>>, vector<8x1xf32>,
    %c1_i32 = arith.constant 1 : i32
    %56 = arith.cmpi eq, %arg1, %c1_i32 : i32
    %57 = arith.extui %56 : i1 to i32
    %c0_i32_28 = arith.constant 0 : i32
    %58 = arith.cmpi ne, %57, %c0_i32_28 : i32
    scf.if %58 {
      %c0_29 = arith.constant 0 : index
      %c0_30 = arith.constant 0 : index
      %59 = vector.load %arg4[%c0_29, %c0_30] : memref<8x1xf32, #tpu.memory_space<vmem>>, vector<8x1xf32>
      %cst_31 = arith.constant 2.000000e-01 : f32
      %60 = vector.broadcast %cst_31 : f32 to vector<8x1xf32>
      %61 = arith.mulf %60, %59 : vector<8x1xf32>
      %c0_32 = arith.constant 0 : index
      %c0_33 = arith.constant 0 : index
      %62 = vector.load %arg8[%c0_32, %c0_33] : memref<8x1xf32, #tpu.memory_space<vmem>>, vector<8x1xf32>
      %cst_34 = arith.constant 0.0571428575 : f32
      %63 = vector.broadcast %cst_34 : f32 to vector<8x1xf32>
      %64 = arith.mulf %63, %62 : vector<8x1xf32>
      %65 = arith.addf %61, %64 : vector<8x1xf32>
      %c0_35 = arith.constant 0 : index
      %c0_36 = arith.constant 0 : index
      %66 = vector.load %arg5[%c0_35, %c0_36] : memref<8x1xf32, #tpu.memory_space<vmem>>, vector<8x1xf32>
      tpu.vector_store %arg5[%c0_35, %c0_36], %65 {strides = array<i32>} : memref<8x1xf32, #tpu.memory_space<vmem>>, vector<8x1xf32>,
      %c0_37 = arith.constant 0 : index
      %c0_38 = arith.constant 0 : index
      %67 = vector.load %arg9[%c0_37, %c0_38] : memref<8x1xf32, #tpu.memory_space<vmem>>, vector<8x1xf32>
      %cst_39 = arith.constant 0.0714285746 : f32
      %68 = vector.broadcast %cst_39 : f32 to vector<8x1xf32>
      %69 = arith.mulf %67, %68 : vector<8x1xf32>
      %70 = tpu.reciprocal %65 {approx = true} : vector<8x1xf32> -> vector<8x1xf32>
      %71 = arith.mulf %69, %70 : vector<8x1xf32>
      %c0_40 = arith.constant 0 : index
      %c0_41 = arith.constant 0 : index
      %72 = vector.load %arg10[%c0_40, %c0_41] : memref<8x1xf32, #tpu.memory_space<vmem>>, vector<8x1xf32>
      %73 = arith.subf %71, %72 : vector<8x1xf32>
      %c0_42 = arith.constant 0 : index
      %c0_43 = arith.constant 0 : index
      %74 = vector.load %arg6[%c0_42, %c0_43] : memref<8x1xf32, #tpu.memory_space<vmem>>, vector<8x1xf32>
      tpu.vector_store %arg6[%c0_42, %c0_43], %73 {strides = array<i32>} : memref<8x1xf32, #tpu.memory_space<vmem>>, vector<8x1xf32>,
    } else {
    }
    return
  }
  func.func @transform_0(%arg0: i32, %arg1: i32) -> (i32, i32) {
    %c0_i32 = arith.constant 0 : i32
    %c0_i32_0 = arith.constant 0 : i32
    return %arg0, %c0_i32 : i32, i32
  }
  func.func @transform_1(%arg0: i32, %arg1: i32) -> (i32, i32) {
    %c0_i32 = arith.constant 0 : i32
    %c0_i32_0 = arith.constant 0 : i32
    return %arg1, %c0_i32 : i32, i32
  }
  func.func @transform_2(%arg0: i32, %arg1: i32) -> (i32, i32) {
    %c0_i32 = arith.constant 0 : i32
    %c0_i32_0 = arith.constant 0 : i32
    return %arg0, %c0_i32 : i32, i32
  }
  func.func @transform_3(%arg0: i32, %arg1: i32) -> (i32, i32) {
    %c0_i32 = arith.constant 0 : i32
    %c0_i32_0 = arith.constant 0 : i32
    return %arg0, %c0_i32 : i32, i32
  }
  func.func @transform_4(%arg0: i32, %arg1: i32) -> (i32, i32) {
    %c0_i32 = arith.constant 0 : i32
    %c0_i32_0 = arith.constant 0 : i32
    return %arg0, %c0_i32 : i32, i32
  }
}

</mosaic_0001>

<bundles_post_ra>
// kernel: tpu_custom_call.1
= control target key start
LH: loop header
LB: loop body
LE: loop exit
PB: predicated region body
PF: predicated region fallthrough
CT: control target
= control target key end

     0   :  { %s1454_s0 = inlined_call_operand.hbm [shape: f32[16,128], index: 0, kind: input, shape index: {}]   ;;  %s1455_s1 = inlined_call_operand.hbm [shape: f32[16,128], index: 1, kind: input, shape index: {}]   ;;  %s1456_s2 = inlined_call_operand.hbm [shape: f32[16,1], index: 2, kind: input, shape index: {}]   ;;  %s1457_s3 = inlined_call_operand.hbm [shape: f32[16,1], index: 3, kind: output, shape index: {0}]   ;;  %s1458_s4 = inlined_call_operand.hbm [shape: f32[16,1], index: 4, kind: output, shape index: {1}]  }
   0x1   :  { %1473 = sst [smem:[#allocation30_spill]] %s1455_s1 }
   0x2   :  { %10 = vsyncpa [#allocation7], 0 }
   0x3   :  { %12 = vsyncpa [#allocation7 + $0x1], 0 }
   0x4   :  { %13 = vsyncpa [#allocation10], 0 }
   0x5   :  { %15 = vsyncpa [#allocation10 + $0x1], 0 }
   0x6   :  { %16 = vsyncpa [#allocation8], 0 }
   0x7   :  { %18 = vsyncpa [#allocation8 + $0x1], 0 }
   0x8   :  { %19 = vsyncpa [#allocation14], 0 }
   0x9   :  { %21 = vsyncpa [#allocation14 + $0x1], 0  ;;  %s1072_s15 = smov 0   ;;  %s1074_s16 = smov 0  }
   0xa   :  { %s1076_s17 = smov 0   ;;  %s1078_s18 = smov 0  }
   0xb   :  { %s1080_s19 = smov 0   ;;  %s1082_s20 = smov 0  }
   0xc   :  { %s1084_s21 = smov 0   ;;  %s1086_s22 = smov 0  }
   0xd   :  { %s1088_s23 = smov 0   ;;  %s1090_s24 = smov 0  }
   0xe   :  { %s1092_s25 = smov 0  }
   0xf LB: > { %1474 = sst [smem:[#allocation20_spill]] %s1005_s17  ;;  %s1126_s26 = sadd.s32 4294967295, %s1037_s25   ;;  %s1037_s25 = sphi %s1092_s25, %s27_s25   ;;  %s1033_s24 = sphi %s1090_s24, %s1513_s24   ;;  %s1029_s23 = sphi %s1088_s23, %s1512_s23   ;;  %s1025_s22 = sphi %s1086_s22, %s1511_s22   ;;  %s1021_s21 = sphi %s1084_s21, %s1510_s21   ;;  %s1017_s20 = sphi %s1082_s20, %s1509_s20   ;;  %s1013_s19 = sphi %s1080_s19, %s1517_s19   ;;  %s1009_s18 = sphi %s1078_s18, %s1516_s18   ;;  %s1005_s17 = sphi %s1076_s17, %s1507_s17   ;;  %s1001_s16 = sphi %s1074_s16, %s1515_s16   ;;  %s997_s15 = sphi %s1072_s15, %s1514_s15  }
  0x10   : > { %1475 = sst [smem:[#allocation21_spill]] %s1009_s18  ;;  %s36_s27 = sadd.s32 1, %s1029_s23 }
  0x11   : > { %1476 = sst [smem:[#allocation22_spill]] %s1017_s20  ;;  %p1129_p0 = scmp.ge.s32.totalorder %s36_s27, 2 }
  0x12   : > { %1477 = sst [smem:[#allocation23_spill]] %s1029_s23  ;;  %p1461_p1 = scmp.eq.s32.totalorder %s1037_s25, 0 }
  0x13   : > { %1478 = sst [smem:[#allocation24_spill]] %s1033_s24  ;;  %p1460_p2 = scmp.eq.s32.totalorder %s1126_s26, 0 }
  0x14   : > { %s72_s29 = sadd.s32 1, %s1005_s17  ;;  %s1519_s27 = smov (%p1129_p0, %s36_s27), 0 }
  0x15   : > { %1480 = sst [smem:[#allocation25_spill]] %s1519_s27  ;;  %p79_p3 = scmp.ne.s32.totalorder %s1005_s17, %s1001_s16 }
  0x16   : > { %p85_p4 = scmp.ne.s32.totalorder %s1001_s16, %s997_s15  ;;  %s69_s30 = ssub.s32 %s1029_s23, %s1519_s27 }
  0x17   : > { %p70_p5 = scmp.eq.s32.totalorder %s69_s30, 0  ;;  %p81_p6 = por %p79_p3, %p1461_p1 }
  0x18   : > { %p1149_p7 = por %p85_p4, %p1460_p2  ;;  %p1459_p8 = scmp.lt.s32.totalorder %s1037_s25, 4 }
  0x19   : > { %s1155_s6 = scalar_select %p70_p5, %s1005_s17, %s72_s29  }
  0x1a   : > { %s1481_s5 = scalar_select %p1149_p7, 1, 0 }
  0x1b   : > { %1482 = sst [smem:[#allocation26_spill]] %s1155_s6  ;;  %s205_s7 = sand.u32 1, %s1037_s25  }
  0x1c   : > { %s207_s8 = sand.u32 1, %s1005_s17   ;;  %s629_s10 = sshll.u32 %s1029_s23, 7 }
  0x1d   : > { %s628_s9 = sshll.u32 %s207_s8, 3  ;;  %s1483_s1 = sld [smem:[#allocation30_spill]] }
  0x1e   : > { %s209_s14 = scalar_lea.vmem [#allocation9], %s628_s9  ;;  %p1169_p9 = pnand %p1459_p8, %p81_p6 }
  0x1f   : > { %s216_s15 = sshll.u32 %s209_s14, 4  ;;  %s1175_s30 = scalar_lea.sflag [#allocation10], %s205_s7  ;;  %s1165_s15 = int_to_ptr.vmem [resolvable:$true] %s216_s15 }
  0x20   : > { %p787_p13 = pneg %p1169_p9 }
  0x23   : > { %s1163_s13 = scalar_lea.hbm %s1483_s1, %s629_s10  ;;  %s790_s11 = scalar_lea.hbm %s1483_s1, 256 }
  0x24   : > { %s785_s8 = scalar_lea.hbm %s1163_s13, 128  ;;  %p791_p5 = scmp.lt.u32.totalorder %s1163_s13, %s1483_s1 }
  0x25   : > { %p786_p12 = scmp.ne.s32.totalorder %s1163_s13, %s785_s8  ;;  %p792_p6 = scmp.lt.u32.totalorder %s790_s11, %s785_s8 }
  0x26   : > { %p794_p2 = scmp.lt.u32.totalorder %s785_s8, %s1163_s13 }
  0x27   : > { %p788_p3 = pnand %p787_p13, %p786_p12  ;;  %p793_p8 = por %p792_p6, %p791_p5 }
  0x29   : > { %p789_p4 = pneg %p788_p3  ;;  %p795_p1 = por %p794_p2, %p793_p8 }
  0x2b   : > { %p796_p10 = pnand %p795_p1, %p789_p4 }
  0x2d   : > { %799 = shalt.err (!%p796_p10)
}
  0x2e   : > { %s800_s7 = scalar_lea.vmem %s1165_s15, 128  ;;  %s1039_s9 = smov [#allocation9]  }
  0x2f   : > { %p801_p12 = scmp.ne.s32.totalorder %s1165_s15, %s800_s7  ;;  %s805_s10 = sshll.u32 %s1039_s9, 4  ;;  %s806_s10 = int_to_ptr.vmem [resolvable:$false] %s805_s10 }
  0x30   : > { %s807_s12 = scalar_lea.vmem %s806_s10, 256  ;;  %p808_p7 = scmp.lt.s32.totalorder %s1165_s15, %s806_s10 }
  0x31   : > { %p803_p3 = pnand %p801_p12, %p787_p13  ;;  %p809_p5 = scmp.lt.s32.totalorder %s807_s12, %s800_s7 }
  0x33   : > { %p804_p11 = pneg %p803_p3  ;;  %p810_p6 = por %p809_p5, %p808_p7 }
  0x35   : > { %p811_p2 = pnand %p810_p6, %p804_p11 }
  0x37   : > { %814 = shalt.err (!%p811_p2)
}
  0x38   : > { %673 = dma.hbm_to_vmem [thread:$0]  (!%p1169_p9), %s1163_s13, 128, %s1165_s15, %s1175_s30  }
  0x39   : > { %p1485_p1 = scmp.lt.s32.totalorder %s1037_s25, 5  ;;  %p1486_p7 = scmp.ge.s32.totalorder %s1037_s25, 1 }
  0x3a   : > { %s623_s8 = sadd.s32 4294967294, %s1037_s25   ;;  %s39_s11 = sadd.s32 1, %s1033_s24 }
  0x3b   : > { %p1207_p8 = pnand %p1486_p7, %p1485_p1  ;;  %s1521_s11 = smov (!%p1129_p0, %s39_s11), %s1033_s24 }
  0x3c   : > { %s46_s14 = sadd.s32 1, %s1017_s20  ;;  %p53_p10 = scmp.ne.s32.totalorder %s1017_s20, %s1013_s19 }
  0x3d   : > { %s1487_s29 = scalar_select %p1207_p8, 1, 0 }
  0x3e   : > { %p41_p11 = scmp.ge.s32.totalorder %s1521_s11, 2  ;;  %p59_p13 = scmp.ne.s32.totalorder %s1013_s19, %s1009_s18 }
  0x3f   : > { %p1488_p4 = scmp.eq.s32.totalorder %s1037_s25, 0  ;;  %p135_p9 = scmp.eq.s32.totalorder %s1126_s26, 3 }
  0x40   : > { %s1523_s11 = smov (%p41_p11, %s1521_s11), 0  ;;  %p1491_p3 = scmp.eq.s32.totalorder %s1126_s26, 0 }
  0x41   : > { %p1223_p12 = por %p1488_p4, %p53_p10  ;;  %1490 = sst [smem:[#allocation27_spill]] %s1523_s11 }
  0x42   : > { %p1232_p5 = por %p1491_p3, %p59_p13  ;;  %p1236_p0 = por %p135_p9, %p53_p10 }
  0x43   : > { %s43_s7 = ssub.s32 %s1033_s24, %s1523_s11  ;;  %p141_p6 = scmp.eq.s32.totalorder %s623_s8, 3 }
  0x44   : > { %s1492_s28 = scalar_select %p1232_p5, 1, 0 }
  0x45   : > { %s1493_s15 = scalar_select %p1236_p0, 1, 0 }
  0x46   : > { %p44_p2 = scmp.eq.s32.totalorder %s43_s7, 0  ;;  %s187_s9 = sand.u32 1, %s1017_s20  }
  0x47   : > { %p1243_p1 = por %p141_p6, %p59_p13  ;;  %s1250_s1 = sshll.u32 %s187_s9, 3 }
  0x48   : > { %s1248_s12 = scalar_select %p44_p2, %s1017_s20, %s46_s14  }
  0x49   : > { %s1494_s10 = scalar_select %p1243_p1, 1, 0 }
  0x4a   : > { %1496 = sst [smem:[#allocation29_spill]] %s1248_s12  ;;  %s627_s27 = sshll.u32 %s1033_s24, 7 }
  0x4b   : > { %1495 = sst [smem:[#allocation28_spill]] %s1494_s10  ;;  %s1256_s17 = scalar_lea.hbm %s1454_s0, %s627_s27 }
  0x4c   : > { %s191_s8 = scalar_lea.vmem [#allocation6], %s1250_s1  ;;  %p1497_p7 = scmp.lt.s32.totalorder %s1037_s25, 4 }
  0x4d   : > { %s198_s7 = sshll.u32 %s191_s8, 4  ;;  %s1272_s6 = scalar_lea.hbm %s1456_s2, %s627_s27  ;;  %s1267_s7 = int_to_ptr.vmem [resolvable:$true] %s198_s7 }
  0x4e   : > { %p1263_p10 = pnand %p1497_p7, %p1223_p12  ;;  %s188_s24 = scalar_lea.sflag [#allocation7], %s187_s9 }
  0x4f   : > { %s815_s12 = scalar_lea.hbm %s1256_s17, 128  ;;  %s820_s20 = scalar_lea.hbm %s1454_s0, 256 }
  0x50   : > { %p816_p11 = scmp.ne.s32.totalorder %s1256_s17, %s815_s12  ;;  %p817_p13 = pneg %p1263_p10 }
  0x51   : > { %p821_p9 = scmp.lt.u32.totalorder %s1256_s17, %s1454_s0  ;;  %p822_p3 = scmp.lt.u32.totalorder %s820_s20, %s815_s12 }
  0x52   : > { %p818_p4 = pnand %p817_p13, %p816_p11  ;;  %p824_p2 = scmp.lt.u32.totalorder %s815_s12, %s1256_s17 }
  0x53   : > { %p823_p6 = por %p822_p3, %p821_p9 }
  0x54   : > { %p819_p12 = pneg %p818_p4 }
  0x55   : > { %p825_p7 = por %p824_p2, %p823_p6 }
  0x57   : > { %p826_p1 = pnand %p825_p7, %p819_p12 }
  0x59   : > { %829 = shalt.err (!%p826_p1)
}
  0x5a   : > { %s830_s27 = scalar_lea.vmem %s1267_s7, 128  ;;  %s1040_s11 = smov [#allocation6]  }
  0x5b   : > { %p831_p11 = scmp.ne.s32.totalorder %s1267_s7, %s830_s27  ;;  %s835_s9 = sshll.u32 %s1040_s11, 4  ;;  %s836_s9 = int_to_ptr.vmem [resolvable:$false] %s835_s9 }
  0x5c   : > { %s837_s18 = scalar_lea.vmem %s836_s9, 256  ;;  %p838_p5 = scmp.lt.s32.totalorder %s1267_s7, %s836_s9 }
  0x5d   : > { %p833_p4 = pnand %p831_p11, %p817_p13  ;;  %p839_p9 = scmp.lt.s32.totalorder %s837_s18, %s830_s27 }
  0x5f   : > { %p834_p0 = pneg %p833_p4  ;;  %p840_p3 = por %p839_p9, %p838_p5 }
  0x61   : > { %p841_p6 = pnand %p840_p3, %p834_p0 }
  0x63   : > { %844 = shalt.err (!%p841_p6)
}
  0x64   : > { %670 = dma.hbm_to_vmem [thread:$0]  (!%p1263_p10), %s1256_s17, 128, %s1267_s7, %s188_s24  }
  0x65   : > { %s227_s20 = scalar_lea.vmem [#allocation11], %s1250_s1  ;;  %s845_s12 = scalar_lea.hbm %s1272_s6, 128 }
  0x66   : > { %s234_s10 = sshll.u32 %s227_s20, 4  ;;  %p846_p1 = scmp.ne.s32.totalorder %s1272_s6, %s845_s12  ;;  %s235_s10 = int_to_ptr.vmem [resolvable:$true] %s234_s10 }
  0x67   : > { %s850_s8 = scalar_lea.hbm %s1456_s2, 256  ;;  %p851_p12 = scmp.lt.u32.totalorder %s1272_s6, %s1456_s2 }
  0x68   : > { %p848_p5 = pnand %p846_p1, %p817_p13  ;;  %p852_p2 = scmp.lt.u32.totalorder %s850_s8, %s845_s12 }
  0x69   : > { %p854_p11 = scmp.lt.u32.totalorder %s845_s12, %s1272_s6 }
  0x6a   : > { %p849_p0 = pneg %p848_p5  ;;  %p853_p7 = por %p852_p2, %p851_p12 }
  0x6c   : > { %p855_p4 = por %p854_p11, %p853_p7 }
  0x6e   : > { %p856_p9 = pnand %p855_p4, %p849_p0 }
  0x70   : > { %859 = shalt.err (!%p856_p9)
}
  0x71   : > { %s860_s1 = scalar_lea.vmem %s235_s10, 128  ;;  %s1041_s17 = smov [#allocation11]  }
  0x72   : > { %p861_p3 = scmp.ne.s32.totalorder %s235_s10, %s860_s1  ;;  %s865_s24 = sshll.u32 %s1041_s17, 4  ;;  %s866_s24 = int_to_ptr.vmem [resolvable:$false] %s865_s24 }
  0x73   : > { %s867_s7 = scalar_lea.vmem %s866_s24, 256  ;;  %p868_p5 = scmp.lt.s32.totalorder %s235_s10, %s866_s24 }
  0x74   : > { %p863_p6 = pnand %p861_p3, %p817_p13  ;;  %p869_p8 = scmp.lt.s32.totalorder %s867_s7, %s860_s1 }
  0x76   : > { %p864_p1 = pneg %p863_p6  ;;  %p870_p2 = por %p869_p8, %p868_p5 }
  0x78   : > { %p871_p12 = pnand %p870_p2, %p864_p1 }
  0x7a   : > { %874 = shalt.err (!%p871_p12)
}
  0x7b   : > { %676 = dma.hbm_to_vmem [thread:$0]  (!%p1263_p10), %s1272_s6, 128, %s235_s10, %s1175_s30  }
  0x7c   : > { %p1499_p0 = scmp.ne.s32.totalorder %s1487_s29, 0 }
  0x7d   : > { %s1323_s9 = sand.u32 (!%p1499_p0), 1, %s1013_s19   ;;  %p1500_p8 = scmp.ne.s32.totalorder (!%p1499_p0), %s1492_s28, 0 }
  0x7e   : > { %243 = sbr.rel (%p1499_p0) target bundleno = 925 (0x39d), region = 32  ;;  %s1326_s18 = sshll.u32 (!%p1499_p0), %s1323_s9, 3 }
  0x7f   : > { %s246_s20 = scalar_lea.sflag (!%p1499_p0), [#allocation7], %s1323_s9  ;;  %s249_s12 = scalar_lea.vmem (!%p1499_p0), [#allocation6], %s1326_s18 }
  0x85   : > { %976 = dma.done.wait (%p1500_p8), %s246_s20, 128  }
  0x86   : > { %978 = vsyncadd (%p1500_p8), %s246_s20, 4294967168  ;;  %s254_s30 = sand.u32 1, %s1126_s26   ;;  %s256_s29 = sand.u32 1, %s1001_s16  }
  0x87   : > { %s634_s14 = sshll.u32 %s256_s29, 3  ;;  %s255_s6 = scalar_lea.sflag [#allocation10], %s254_s30 }
  0x88   : > { %s258_s10 = scalar_lea.vmem [#allocation9], %s634_s14  ;;  %p1501_p10 = scmp.ne.s32.totalorder %s1481_s5, 0 }
  0x8a   : > { %980 = dma.done.wait (%p1501_p10), %s255_s6, 128  }
  0x8b   : > { %982 = vsyncadd (%p1501_p10), %s255_s6, 4294967168  ;;  %s267_s23 = scalar_lea.vmem [#allocation11], %s1326_s18 }
  0x8c   : > { %984 = dma.done.wait (%p1500_p8), %s255_s6, 128  }
  0x8d   : > { %986 = vsyncadd (%p1500_p8), %s255_s6, 4294967168  ;;  %s299_s26 = scalar_lea.vmem [#allocation12], %s1326_s18  ;;  %s306_s13 = scalar_lea.vmem [#allocation13], %s1326_s18 }
  0x8e   : > { %p638_p13 = scmp.ne.s32.totalorder %s1021_s21, 0 }
  0x8f   : > { %v312_v0 = vld [vmem:[%s249_s12] sm:$0xff] (!%p638_p13)  ;;  %vm321_vm0 = vcmask (!%p638_p13), 7168   ;;  %v1042_v2 = vmov (!%p638_p13), 0.0  }
  0x90   : > { %311 = sbr.rel (%p638_p13) target bundleno = 306 (0x132), region = 48  ;;  %v313_v1 = vmul.f32 (!%p638_p13), %v312_v0, %v312_v0  ;;  %322 = vst.msk [vmem:[#allocation3] sm:$0xff] (!%p638_p13), %vm321_vm0, %v1042_v2  ;;  %323 = vst.msk [vmem:[#allocation4] sm:$0xff] (!%p638_p13), %vm321_vm0, %v1042_v2 }
  0x91   : > { %324 = vst.msk [vmem:[#allocation5] sm:$0xff] (!%p638_p13), %vm321_vm0, %v1042_v2 }
  0x92   : > { %314 = vadd.xlane.f32.xlu0 (!%p638_p13), %v313_v1 }
 0x11f   : > { %v315_v3 = vpop.xlane.xlu0 %314 }
 0x120   : > { %v316_v4 = vmax.f32 %v315_v3, 1e-24 }
 0x122   : > { %777 = vrsqrt.f32 %v316_v4 }
 0x12c   : > { %v778_v5 = vpop.eup %777 }
 0x12d   : > { %v318_v6 = vmul.f32 %v778_v5, %v312_v0 }
 0x12f   : > { %v319_v7 = vpack.c.bf16 %v318_v6, %v318_v6 }
 0x131   : > { %320 = vst [vmem:[#allocation2] sm:$0xf] %v319_v7 }
 0x132 PF: > { %v325_v8 = vld [vmem:[%s258_s10] sm:$0xff]  ;;  %v1043_v10 = vmov 0.0   ;;  %vm1044_vm1 = vmmov 0   ;;  %v375_v17 = vlaneseq  ;;  %s639_s5 = sshll.u32 %s1025_s22, 3  ;;  %s640_s28 = sshll.u32 %s1021_s21, 3  ;;  %vm396_vm6 = vcmask 64512  }
 0x133   : > { %v326_v9 = vmul.f32 %v325_v8, %v325_v8  ;;  %651 = vmatprep.subr.bf16.mxu0 %v1043_v10  ;;  %653 = vmatprep.mubr.msk.bf16.mxu0 %vm1044_vm1, %v1043_v10  ;;  %v377_v19 = vstv %s639_s5  ;;  %v382_v28 = vstv %s640_s28  ;;  %v395_v40 = vld [vmem:[#allocation3] sm:$0xff]  ;;  %vm401_vm7 = vcmask 7168   ;;  %v403_v42 = vld [vmem:[#allocation4] sm:$0xff]  ;;  %v410_v46 = vld [vmem:[#allocation5] sm:$0xff]  ;;  %p642_p7 = scmp.ne.s32.totalorder %s1021_s21, 1 }
 0x134   : > { %v376_v18 = vshrl.u32 %v375_v17, 7  ;;  %v381_v27 = vand.u32 127, %v375_v17  ;;  %v421_v49 = vld [vmem:[%s267_s23] sm:$0xff] (!%p642_p7) }
 0x135   : > { %327 = vadd.xlane.f32.xlu0 %v326_v9  ;;  %v422_v51 = vmul.f32 (!%p642_p7), 0.2, %v421_v49 }
 0x136   : > { %v378_v23 = vadd.s32 %v377_v19, %v376_v18  ;;  %v383_v31 = vadd.s32 %v382_v28, %v381_v27 }
 0x138   : > { %v333_v16 = vld [vmem:[#allocation2] sm:$0xf]  ;;  %v385_v29 = vadd.s32 8, %v378_v23  ;;  %v641_v30 = vadd.s32 4294967288, %v378_v23  ;;  %vm384_vm2 = vcmp.lt.s32.totalorder %v378_v23, 8  ;;  %vm389_vm3 = vcmp.eq.s32.totalorder %v383_v31, %v378_v23 }
 0x13a   : > { %v387_v32 = vsel %vm384_vm2, %v385_v29, %v641_v30 }
 0x13b   : > { %vm388_vm4 = vcmp.eq.s32.totalorder %v383_v31, %v387_v32 }
 0x13c   : > { %vm390_vm5 = vmor %vm388_vm4, %vm389_vm3 }
 0x1c2   : > { %v328_v11 = vpop.xlane.xlu0 %327 }
 0x1c3   : > { %v329_v12 = vmax.f32 %v328_v11, 1e-24 }
 0x1c5   : > { %779 = vrsqrt.f32 %v329_v12 }
 0x1cf   : > { %v780_v13 = vpop.eup %779 }
 0x1d0   : > { %v331_v14 = vmul.f32 %v780_v13, %v325_v8 }
 0x1d2   : > { %v332_v15 = vpack.c.bf16 %v331_v14, %v331_v14 }
 0x1d4   : > { %652 = vmatpush3.bf16.xpose.msra.mxu0 %v332_v15 }
 0x1db   : > { %654 = vmatmul.mubr.bf16.vlgmr.msra.gmra.mrb[0].mxu0 %v333_v16 }
 0x2ae   : > { %v368_v20 = vpop.f32.mrb[0].mxu0 }
 0x2af   : > { %v391_v21 = vmul.f32 10.0, %v368_v20  ;;  %v655_v22 = vpop.f32.mrb[1].mxu0  ;;  %v411_v38 = vsel %vm388_vm4, %v368_v20, 0.0 }
 0x2b0   : > { %v371_v24 = vpop.f32.mrb[2].mxu0  ;;  %v412_v39 = vsel %vm396_vm6, %v411_v38, 0.0 }
 0x2b1   : > { %v392_v25 = vmul.f32 1.442695, %v391_v21  ;;  %v656_v26 = vpop.f32.mrb[3].mxu0 }
 0x2b3   : > { %781 = vpow2.f32 %v392_v25 }
 0x2bd   : > { %v782_v33 = vpop.eup %781 }
 0x2be   : > { %v394_v34 = vsel %vm390_vm5, 0.0, %v782_v33 }
 0x2bf   : > { %v397_v35 = vsel %vm396_vm6, %v394_v34, 0.0  ;;  %v404_v36 = vmul.f32 %v394_v34, %v368_v20 }
 0x2c0   : > { %398 = vadd.xlane.f32.xlu0 %v397_v35 }
 0x2c1   : > { %v405_v37 = vsel %vm396_vm6, %v404_v36, 0.0 }
 0x2c2   : > { %406 = vadd.xlane.f32.xlu1 %v405_v37 }
 0x2c6   : > { %413 = vadd.xlane.f32.xlu1 %v412_v39 }
 0x34d   : > { %v399_v41 = vpop.xlane.xlu0 %398 }
 0x34e   : > { %v400_v43 = vadd.f32 %v399_v41, %v395_v40 }
 0x34f   : > { %v407_v44 = vpop.xlane.xlu1 %406 }
 0x350   : > { %402 = vst.msk [vmem:[#allocation3] sm:$0xff] %vm401_vm7, %v400_v43  ;;  %v408_v45 = vadd.f32 %v407_v44, %v403_v42  ;;  %420 = sbr.rel (%p642_p7) target bundleno = 876 (0x36c), region = 52 }
 0x352   : > { %409 = vst.msk [vmem:[#allocation4] sm:$0xff] %vm401_vm7, %v408_v45 }
 0x353   : > { %v414_v47 = vpop.xlane.xlu1 %413 }
 0x354   : > { %v415_v48 = vadd.f32 %v414_v47, %v410_v46 }
 0x356   : > { %416 = vst.msk [vmem:[#allocation5] sm:$0xff] %vm401_vm7, %v415_v48 }
 0x357   : > { %v423_v50 = vld [vmem:[#allocation3] sm:$0xff] }
 0x358   : > { %v424_v52 = vmul.f32 0.057142857, %v423_v50 }
 0x359   : > { %v427_v54 = vld [vmem:[#allocation4] sm:$0xff] }
 0x35a   : > { %v425_v53 = vadd.f32 %v424_v52, %v422_v51  ;;  %v428_v55 = vmul.f32 0.071428575, %v427_v54 }
 0x35c   : > { %426 = vst.msk [vmem:[%s299_s26] sm:$0xff] %vm401_vm7, %v425_v53  ;;  %783 = vrcp.f32 %v425_v53 }
 0x35d   : > { %v431_v57 = vld [vmem:[#allocation5] sm:$0xff] }
 0x366   : > { %v784_v56 = vpop.eup %783 }
 0x367   : > { %v430_v58 = vmul.f32 %v784_v56, %v428_v55 }
 0x369   : > { %v432_v59 = vsub.f32 %v430_v58, %v431_v57 }
 0x36b   : > { %433 = vst.msk [vmem:[%s306_s13] sm:$0xff] %vm401_vm7, %v432_v59 }
 0x36c PF: > { %s645_s21 = sshll.u32 %s1025_s22, 7  ;;  %s453_s1 = sshll.u32 %s299_s26, 4  ;;  %s454_s1 = int_to_ptr.vmem [resolvable:$true] %s453_s1 }
 0x36d   : > { %s1368_s11 = scalar_lea.hbm %s1457_s3, %s645_s21  ;;  %s435_s17 = scalar_lea.sflag [#allocation8], %s1323_s9 }
 0x36e   : > { %s875_s24 = scalar_lea.vmem %s454_s1, 128  ;;  %p1502_p4 = scmp.ne.s32.totalorder %s1493_s15, 0 }
 0x36f   : > { %p876_p11 = scmp.ne.s32.totalorder %s454_s1, %s875_s24  ;;  %s1045_s7 = smov [#allocation12]  }
 0x370   : > { %s879_s20 = sshll.u32 %s1045_s7, 4  ;;  %s880_s20 = int_to_ptr.vmem [resolvable:$false] %s879_s20 }
 0x371   : > { %p877_p9 = pnand %p876_p11, %p1502_p4  ;;  %s881_s12 = scalar_lea.vmem %s880_s20, 256 }
 0x372   : > { %p882_p6 = scmp.lt.s32.totalorder %s454_s1, %s880_s20  ;;  %p883_p1 = scmp.lt.s32.totalorder %s881_s12, %s875_s24 }
 0x373   : > { %p878_p3 = pneg %p877_p9 }
 0x374   : > { %p884_p5 = por %p883_p1, %p882_p6 }
 0x376   : > { %p885_p2 = pnand %p884_p5, %p878_p3 }
 0x378   : > { %888 = shalt.err (!%p885_p2)
}
 0x379   : > { %s889_s30 = scalar_lea.hbm %s1368_s11, 128  ;;  %s893_s6 = scalar_lea.hbm %s1457_s3, 256 }
 0x37a   : > { %p890_p12 = scmp.ne.s32.totalorder %s1368_s11, %s889_s30  ;;  %p894_p10 = scmp.lt.u32.totalorder %s1368_s11, %s1457_s3 }
 0x37b   : > { %p895_p13 = scmp.lt.u32.totalorder %s893_s6, %s889_s30  ;;  %p897_p11 = scmp.lt.u32.totalorder %s889_s30, %s1368_s11 }
 0x37c   : > { %p891_p0 = pnand %p890_p12, %p1502_p4 }
 0x37d   : > { %p896_p7 = por %p895_p13, %p894_p10 }
 0x37e   : > { %p892_p8 = pneg %p891_p0 }
 0x37f   : > { %p898_p9 = por %p897_p11, %p896_p7 }
 0x381   : > { %p899_p3 = pnand %p898_p9, %p892_p8 }
 0x383   : > { %902 = shalt.err (!%p899_p3)
}
 0x384   : > { %663 = dma.vmem_to_hbm [thread:$0]  (%p1502_p4), %s454_s1, 128, %s1368_s11, %s435_s17  }
 0x385   : > { %s1395_s28 = scalar_lea.hbm %s1458_s4, %s645_s21  ;;  %s466_s8 = sshll.u32 %s306_s13, 4  ;;  %s467_s8 = int_to_ptr.vmem [resolvable:$true] %s466_s8 }
 0x386   : > { %s440_s27 = scalar_lea.sflag [#allocation14], %s1323_s9  ;;  %s903_s24 = scalar_lea.vmem %s467_s8, 128 }
 0x387   : > { %p904_p6 = scmp.ne.s32.totalorder %s467_s8, %s903_s24  ;;  %s1046_s7 = smov [#allocation13]  }
 0x388   : > { %s907_s20 = sshll.u32 %s1046_s7, 4  ;;  %s908_s20 = int_to_ptr.vmem [resolvable:$false] %s907_s20 }
 0x389   : > { %p905_p1 = pnand %p904_p6, %p1502_p4  ;;  %s909_s12 = scalar_lea.vmem %s908_s20, 256 }
 0x38a   : > { %p910_p2 = scmp.lt.s32.totalorder %s467_s8, %s908_s20  ;;  %p911_p12 = scmp.lt.s32.totalorder %s909_s12, %s903_s24 }
 0x38b   : > { %p906_p5 = pneg %p905_p1 }
 0x38c   : > { %p912_p0 = por %p911_p12, %p910_p2 }
 0x38e   : > { %p913_p8 = pnand %p912_p0, %p906_p5 }
 0x390   : > { %916 = shalt.err (!%p913_p8)
}
 0x391   : > { %s917_s22 = scalar_lea.hbm %s1395_s28, 128  ;;  %s921_s13 = scalar_lea.hbm %s1458_s4, 256 }
 0x392   : > { %p918_p10 = scmp.ne.s32.totalorder %s1395_s28, %s917_s22  ;;  %p922_p11 = scmp.lt.u32.totalorder %s1395_s28, %s1458_s4 }
 0x393   : > { %p923_p9 = scmp.lt.u32.totalorder %s921_s13, %s917_s22  ;;  %p925_p6 = scmp.lt.u32.totalorder %s917_s22, %s1395_s28 }
 0x394   : > { %p919_p13 = pnand %p918_p10, %p1502_p4 }
 0x395   : > { %p924_p3 = por %p923_p9, %p922_p11 }
 0x396   : > { %p920_p7 = pneg %p919_p13 }
 0x397   : > { %p926_p1 = por %p925_p6, %p924_p3 }
 0x399   : > { %p927_p5 = pnand %p926_p1, %p920_p7 }
 0x39b   : > { %930 = shalt.err (!%p927_p5)
}
 0x39c   : > { %664 = dma.vmem_to_hbm [thread:$0]  (%p1502_p4), %s467_s8, 128, %s1395_s28, %s440_s27  }
 0x39d PF: > { %s1503_s1 = sld [smem:[#allocation21_spill]]  ;;  %s1504_s17 = sld [smem:[#allocation28_spill]] }
 0x39e   : > { %p685_p2 = scmp.ge.s32.totalorder %s1037_s25, 2 }
 0x3a3   : > { %s478_s30 = sand.u32 1, %s1503_s1   ;;  %p1505_p12 = scmp.ne.s32.totalorder %s1504_s17, 0 }
 0x3a4   : > { %s479_s29 = scalar_lea.sflag [#allocation8], %s478_s30 }
 0x3a5   : > { %p678_p0 = pnand %p685_p2, %p1505_p12 }
 0x3a7   : > { %988 = dma.done.wait (!%p678_p0), %s479_s29, 128  }
 0x3a8   : > { %990 = vsyncadd (!%p678_p0), %s479_s29, 4294967168  ;;  %s488_s14 = scalar_lea.sflag [#allocation14], %s478_s30 }
 0x3a9   : > { %992 = dma.done.wait (!%p678_p0), %s488_s14, 128  }
 0x3aa   : > { %994 = vsyncadd (!%p678_p0), %s488_s14, 4294967168  ;;  %s27_s25 = sadd.s32 1, %s1037_s25   ;;  %s1506_s6 = sld [smem:[#allocation20_spill]] }
 0x3ab   : > { %p24_p8 = scmp.ge.s32.totalorder %s27_s25, 6   ;;  %s1507_s17 = sld [smem:[#allocation26_spill]] }
 0x3ac   : > { %s1508_s10 = sld [smem:[#allocation22_spill]]  ;;  %s1509_s20 = sld [smem:[#allocation29_spill]] }
 0x3ad   : > { %s1510_s21 = sld [smem:[#allocation23_spill]]  ;;  %s1511_s22 = sld [smem:[#allocation24_spill]] }
 0x3ae   : > { %s1512_s23 = sld [smem:[#allocation25_spill]]  ;;  %s1513_s24 = sld [smem:[#allocation27_spill]] }
 0x3af   : > { %s1514_s15 = smov %s1001_s16  ;;  %s1516_s18 = smov %s1013_s19 }
 0x3b0   : > { %s1515_s16 = smov %s1506_s6  ;;  %26 = sbr.rel (!%p24_p8) target bundleno = 15 (0xf), region = 126 }
 0x3b2   : > { %s1517_s19 = smov %s1508_s10 }
 0x3b7   :  { %493 = vsyncpa [#allocation7], 1 }
 0x3b8   :  { %495 = vsyncpa [#allocation7 + $0x1], 1 }
 0x3b9   :  { %496 = vsyncpa [#allocation10], 1 }
 0x3ba   :  { %498 = vsyncpa [#allocation10 + $0x1], 1 }
 0x3bb   :  { %499 = vsyncpa [#allocation8], 1 }
 0x3bc   :  { %501 = vsyncpa [#allocation8 + $0x1], 1 }
 0x3bd   :  { %502 = vsyncpa [#allocation14], 1 }
 0x3be   :  { %504 = vsyncpa [#allocation14 + $0x1], 1 }

</bundles_post_ra>
